<compile_context>
chip_gen: v7x
topology: tpu7x:2x2x1
jax: 0.10.0
libtpu: 0.0.40
codegen_flags: <defaults>
</compile_context>

<pallas_src>
import functools

import jax
import jax.numpy as jnp
from jax.experimental import pallas as pl
from jax.experimental.pallas import tpu as pltpu


def _round_up(x, m):
    return ((x + m - 1) // m) * m


def _lightgcn_kernel(a_ref, ego_k_ref, ego_row_ref, out_ref, acc_ref, *, num_layers):
    # a_ref:       (tile_m, tile_k)  block of the normalized adjacency
    # ego_k_ref:   (tile_k, E_pad)   K-slab of the ego embeddings (matmul RHS)
    # ego_row_ref: (tile_m, E_pad)   row block of ego (layer-0 term, constant over K)
    # out_ref:     (tile_m, E_pad)   row block of the mean-pooled final embeddings
    # acc_ref:     (tile_m, E_pad)   f32 accumulator for A_hat @ E0
    k = pl.program_id(1)

    @pl.when(k == 0)
    def _init():
        acc_ref[...] = jnp.zeros_like(acc_ref)

    acc_ref[...] += jnp.dot(
        a_ref[...], ego_k_ref[...], preferred_element_type=jnp.float32
    )

    @pl.when(k == pl.num_programs(1) - 1)
    def _finalize():
        # mean over [E0, A@E0, ..., A@E0]  ==  (E0 + L * A@E0) / (L + 1)
        e0 = ego_row_ref[...].astype(jnp.float32)
        scale = 1.0 / float(num_layers + 1)
        out_ref[...] = (
            (e0 + float(num_layers) * acc_ref[...]) * scale
        ).astype(out_ref.dtype)


def lightgcn_final_embeddings(norm_adj, ego_embeddings, num_layers, *,
                              tile_m=256, tile_k=512,
                              compute_dtype=jnp.float32):
    """final_embeddings = mean over stacked [E0, A@E0, ..., A@E0] (num_layers+1 terms)."""
    N, E = ego_embeddings.shape
    assert norm_adj.shape == (N, N)

    # Tile sizes: second-to-last dims multiples of 8, last dims multiples of 128
    # (or full extent). Clamp for small problems, lane-pad E for dense stores.
    E_pad = _round_up(E, 128)
    tile_m = min(tile_m, _round_up(N, 8))
    tile_k = min(tile_k, _round_up(N, 128))
    n_pad_m = _round_up(N, tile_m)
    n_pad_k = _round_up(N, tile_k)

    # Zero-padding keeps the matmul exact (padded K-columns / rows contribute 0).
    a = jnp.pad(norm_adj.astype(compute_dtype),
                ((0, n_pad_m - N), (0, n_pad_k - N)))
    ego_k = jnp.pad(ego_embeddings.astype(compute_dtype),
                    ((0, n_pad_k - N), (0, E_pad - E)))
    # Layer-0 term kept in f32 so the E0 contribution is exact even in bf16 mode.
    ego_row = jnp.pad(ego_embeddings.astype(jnp.float32),
                      ((0, n_pad_m - N), (0, E_pad - E)))

    grid = (n_pad_m // tile_m, n_pad_k // tile_k)

    cbytes = jnp.dtype(compute_dtype).itemsize
    vmem_bytes = (
        2 * tile_m * tile_k * cbytes   # A block, double-buffered
        + 2 * tile_k * E_pad * cbytes  # ego K-slab, double-buffered
        + 2 * tile_m * E_pad * 4       # ego row block (f32)
        + 2 * tile_m * E_pad * 4       # output block
        + tile_m * E_pad * 4           # f32 accumulator scratch
    )
    vmem_limit = min(max(2 * vmem_bytes, 4 << 20), 48 << 20)  # fits v7x's 64 MiB

    kernel = functools.partial(_lightgcn_kernel, num_layers=num_layers)
    out = pl.pallas_call(
        kernel,
        out_shape=jax.ShapeDtypeStruct((n_pad_m, E_pad), jnp.float32),
        grid_spec=pltpu.PrefetchScalarGridSpec(
            num_scalar_prefetch=0,
            grid=grid,
            in_specs=[
                pl.BlockSpec((tile_m, tile_k), lambda i, k: (i, k)),  # adjacency tile
                pl.BlockSpec((tile_k, E_pad), lambda i, k: (k, 0)),   # ego K-slab
                pl.BlockSpec((tile_m, E_pad), lambda i, k: (i, 0)),   # ego row block
            ],
            out_specs=pl.BlockSpec((tile_m, E_pad), lambda i, k: (i, 0)),
            scratch_shapes=[pltpu.VMEM((tile_m, E_pad), jnp.float32)],
        ),
        compiler_params=pltpu.CompilerParams(
            dimension_semantics=("parallel", "arbitrary"),
            vmem_limit_bytes=vmem_limit,
        ),
    )(a, ego_k, ego_row)

    return out[:N, :E].astype(ego_embeddings.dtype)


def lightgcn_forward(norm_adj, user_emb, item_emb, users, pos_items, neg_items,
                     num_layers, *, compute_dtype=jnp.float32):
    """Pallas-backed equivalent of LightGCN_implicit.forward (drop_flag=False)."""
    # TODO(synk): drop_flag=True (sparse_dropout on the adjacency) not implemented.
    num_users = user_emb.shape[0]
    ego = jnp.concatenate([user_emb, item_emb], axis=0)
    final = lightgcn_final_embeddings(norm_adj, ego, num_layers,
                                      compute_dtype=compute_dtype)
    u_g = final[:num_users, :]
    i_g = final[num_users:, :]
    u_g_embeddings = jnp.take(u_g, users, axis=0)
    pos_i_g_embeddings = jnp.take(i_g, pos_items, axis=0)
    neg_i_g_embeddings = jnp.take(i_g, neg_items, axis=0)
    return u_g_embeddings, pos_i_g_embeddings, neg_i_g_embeddings, i_g


# ------------------------- setup helpers (plain JAX glue) -------------------------

def make_norm_adj(R):
    """Dense version of create_adj_mat: D^-1/2 [[0,R],[R^T,0]] D^-1/2."""
    nu, ni = R.shape
    N = nu + ni
    A = jnp.zeros((N, N), dtype=jnp.float32)
    A = A.at[:nu, nu:].set(R)
    A = A.at[nu:, :nu].set(R.T)
    rowsum = A.sum(axis=1)
    d_inv = jnp.where(rowsum > 0, rowsum ** -0.5, 0.0)
    return d_inv[:, None] * A * d_inv[None, :]


def xavier_uniform(key, shape):
    fan_in, fan_out = shape[0], shape[1]
    bound = (6.0 / (fan_in + fan_out)) ** 0.5
    return jax.random.uniform(key, shape, jnp.float32, -bound, bound)


if __name__ == "__main__":
    key = jax.random.PRNGKey(0)
    k_r, k_u, k_i, k_users, k_pos, k_neg = jax.random.split(key, 6)

    num_users, num_items, emb_size, num_layers = 32, 96, 32, 3
    N = num_users + num_items  # 128
    batch = 8

    # Deterministic synthetic interaction matrix and parameters.
    R = (jax.random.uniform(k_r, (num_users, num_items)) < 0.25).astype(jnp.float32)
    norm_adj = make_norm_adj(R)
    user_emb = xavier_uniform(k_u, (num_users, emb_size))
    item_emb = xavier_uniform(k_i, (num_items, emb_size))

    users = jax.random.randint(k_users, (batch,), 0, num_users)
    pos_items = jax.random.randint(k_pos, (batch,), 0, num_items)
    neg_items = jax.random.randint(k_neg, (batch,), 0, num_items)

    # Full-precision path (strict check against the reference).
    u_g, pos_g, neg_g, i_g = lightgcn_forward(
        norm_adj, user_emb, item_emb, users, pos_items, neg_items, num_layers
    )
    jax.block_until_ready((u_g, pos_g, neg_g, i_g))

    # Pure-JAX reference reproducing the PyTorch forward exactly.
    ego = jnp.concatenate([user_emb, item_emb], axis=0)
    all_emb = [ego]
    for _ in range(num_layers):
        all_emb.append(norm_adj @ ego)  # ego never reassigned, as in the module
    final_ref = jnp.mean(jnp.stack(all_emb, axis=1), axis=1)
    u_ref = final_ref[:num_users][users]
    pos_ref = final_ref[num_users:][pos_items]
    neg_ref = final_ref[num_users:][neg_items]
    i_ref = final_ref[num_users:]

    assert jnp.allclose(u_g, u_ref, atol=1e-5, rtol=1e-5)
    assert jnp.allclose(pos_g, pos_ref, atol=1e-5, rtol=1e-5)
    assert jnp.allclose(neg_g, neg_ref, atol=1e-5, rtol=1e-5)
    assert jnp.allclose(i_g, i_ref, atol=1e-5, rtol=1e-5)

    # bf16 matmul-operand path (halves adjacency HBM traffic; f32 MXU accumulation).
    final_bf16 = lightgcn_final_embeddings(
        norm_adj, ego, num_layers, compute_dtype=jnp.bfloat16
    )
    jax.block_until_ready(final_bf16)
    assert jnp.allclose(final_bf16, final_ref, atol=2e-2, rtol=2e-2)

    print("KERNEL_OK")
</pallas_src>

<mosaic_0001>
module attributes {stable_mosaic.version = 11 : i64} {
  func.func @_lightgcn_kernel(%arg0: i32, %arg1: i32, %arg2: memref<128x128xf32, #tpu.memory_space<vmem>>, %arg3: memref<128x128xf32, #tpu.memory_space<vmem>>, %arg4: memref<128x128xf32, #tpu.memory_space<vmem>>, %arg5: memref<128x128xf32, #tpu.memory_space<vmem>>, %arg6: memref<128x128xf32, #tpu.memory_space<vmem>>) attributes {dimension_semantics = [#tpu.dimension_semantics<parallel>, #tpu.dimension_semantics<arbitrary>], iteration_bounds = array<i64: 1, 1>, scalar_prefetch = 0 : i64, scratch_operands = 1 : i64, tpu.core_type = #tpu.core_type<tc>, window_params = [{transform_indices = @transform_0, window_bounds = array<i64: 128, 128>}, {transform_indices = @transform_1, window_bounds = array<i64: 128, 128>}, {transform_indices = @transform_2, window_bounds = array<i64: 128, 128>}, {transform_indices = @transform_3, window_bounds = array<i64: 128, 128>}]} {
    %c0_i32 = arith.constant 0 : i32
    %0 = arith.cmpi eq, %arg1, %c0_i32 : i32
    %1 = arith.extui %0 : i1 to i32
    %c0_i32_0 = arith.constant 0 : i32
    %2 = arith.cmpi ne, %1, %c0_i32_0 : i32
    scf.if %2 {
      %cst_10 = arith.constant 0.000000e+00 : f32
      %12 = vector.broadcast %cst_10 : f32 to vector<128x128xf32>
      %c0_11 = arith.constant 0 : index
      %c0_12 = arith.constant 0 : index
      %13 = vector.load %arg6[%c0_11, %c0_12] : memref<128x128xf32, #tpu.memory_space<vmem>>, vector<128x128xf32>
      tpu.vector_store %arg6[%c0_11, %c0_12], %12 {strides = array<i32>} : memref<128x128xf32, #tpu.memory_space<vmem>>, vector<128x128xf32>,
    } else {
    }
    %c0 = arith.constant 0 : index
    %c0_1 = arith.constant 0 : index
    %3 = vector.load %arg6[%c0, %c0_1] : memref<128x128xf32, #tpu.memory_space<vmem>>, vector<128x128xf32>
    %c0_2 = arith.constant 0 : index
    %c0_3 = arith.constant 0 : index
    %4 = vector.load %arg2[%c0_2, %c0_3] : memref<128x128xf32, #tpu.memory_space<vmem>>, vector<128x128xf32>
    %c0_4 = arith.constant 0 : index
    %c0_5 = arith.constant 0 : index
    %5 = vector.load %arg3[%c0_4, %c0_5] : memref<128x128xf32, #tpu.memory_space<vmem>>, vector<128x128xf32>
    %cst = arith.constant dense<0.000000e+00> : vector<128x128xf32>
    %6 = tpu.matmul %4, %5, %cst {dimension_numbers = #tpu.dot_dimension_numbers<[1], [0], [0], [1], [0, 0, 1, 1], [], []>} : vector<128x128xf32>, vector<128x128xf32>, vector<128x128xf32> -> vector<128x128xf32>
    %7 = arith.addf %3, %6 : vector<128x128xf32>
    %c0_6 = arith.constant 0 : index
    %c0_7 = arith.constant 0 : index
    %8 = vector.load %arg6[%c0_6, %c0_7] : memref<128x128xf32, #tpu.memory_space<vmem>>, vector<128x128xf32>
    tpu.vector_store %arg6[%c0_6, %c0_7], %7 {strides = array<i32>} : memref<128x128xf32, #tpu.memory_space<vmem>>, vector<128x128xf32>,
    %c0_i32_8 = arith.constant 0 : i32
    %9 = arith.cmpi eq, %arg1, %c0_i32_8 : i32
    %10 = arith.extui %9 : i1 to i32
    %c0_i32_9 = arith.constant 0 : i32
    %11 = arith.cmpi ne, %10, %c0_i32_9 : i32
    scf.if %11 {
      %c0_10 = arith.constant 0 : index
      %c0_11 = arith.constant 0 : index
      %12 = vector.load %arg4[%c0_10, %c0_11] : memref<128x128xf32, #tpu.memory_space<vmem>>, vector<128x128xf32>
      %c0_12 = arith.constant 0 : index
      %c0_13 = arith.constant 0 : index
      %13 = vector.load %arg6[%c0_12, %c0_13] : memref<128x128xf32, #tpu.memory_space<vmem>>, vector<128x128xf32>
      %cst_14 = arith.constant 3.000000e+00 : f32
      %14 = vector.broadcast %cst_14 : f32 to vector<128x128xf32>
      %15 = arith.mulf %14, %13 : vector<128x128xf32>
      %16 = arith.addf %12, %15 : vector<128x128xf32>
      %cst_15 = arith.constant 2.500000e-01 : f32
      %17 = vector.broadcast %cst_15 : f32 to vector<128x128xf32>
      %18 = arith.mulf %16, %17 : vector<128x128xf32>
      %c0_16 = arith.constant 0 : index
      %c0_17 = arith.constant 0 : index
      %19 = vector.load %arg5[%c0_16, %c0_17] : memref<128x128xf32, #tpu.memory_space<vmem>>, vector<128x128xf32>
      tpu.vector_store %arg5[%c0_16, %c0_17], %18 {strides = array<i32>} : memref<128x128xf32, #tpu.memory_space<vmem>>, vector<128x128xf32>,
    } else {
    }
    return
  }
  func.func @transform_0(%arg0: i32, %arg1: i32) -> (i32, i32) {
    %c0_i32 = arith.constant 0 : i32
    return %arg0, %arg1 : i32, i32
  }
  func.func @transform_1(%arg0: i32, %arg1: i32) -> (i32, i32) {
    %c0_i32 = arith.constant 0 : i32
    %c0_i32_0 = arith.constant 0 : i32
    return %arg1, %c0_i32 : i32, i32
  }
  func.func @transform_2(%arg0: i32, %arg1: i32) -> (i32, i32) {
    %c0_i32 = arith.constant 0 : i32
    %c0_i32_0 = arith.constant 0 : i32
    return %arg0, %c0_i32 : i32, i32
  }
  func.func @transform_3(%arg0: i32, %arg1: i32) -> (i32, i32) {
    %c0_i32 = arith.constant 0 : i32
    %c0_i32_0 = arith.constant 0 : i32
    return %arg0, %c0_i32 : i32, i32
  }
}

</mosaic_0001>

<bundles_post_ra>
// kernel: tpu_custom_call.1
= control target key start
LH: loop header
LB: loop body
LE: loop exit
PB: predicated region body
PF: predicated region fallthrough
CT: control target
= control target key end

     0   :  { %8 = vsyncpa [#allocation4], 0  ;;  %s747_s0 = inlined_call_operand.hbm [shape: f32[128,128], index: 0, kind: input, shape index: {}]   ;;  %s748_s1 = inlined_call_operand.hbm [shape: f32[128,128], index: 1, kind: input, shape index: {}]   ;;  %s749_s2 = inlined_call_operand.hbm [shape: f32[128,128], index: 2, kind: input, shape index: {}]   ;;  %s750_s3 = inlined_call_operand.hbm [shape: f32[128,128], index: 3, kind: output, shape index: {}]  }
   0x1   :  { %9 = vsyncpa [#allocation7], 0 }
   0x2   :  { %10 = vsyncpa [#allocation5], 0  ;;  %s654_s12 = smov [#allocation6]   ;;  %s655_s14 = smov [#allocation3]  }
   0x3   :  { %s28_s13 = sshll.u32 %s654_s12, 4  ;;  %s16_s15 = sshll.u32 %s655_s14, 4  ;;  %s29_s13 = int_to_ptr.vmem [resolvable:$true] %s28_s13  ;;  %s680_s15 = int_to_ptr.vmem [resolvable:$true] %s16_s15 }
   0x4   :  { %s560_s18 = scalar_lea.hbm %s748_s1, 2048 }
   0x5   :  { %p561_p0 = scmp.ne.s32.totalorder %s748_s1, %s560_s18  ;;  %p564_p1 = scmp.lt.u32.totalorder %s560_s18, %s748_s1 }
   0x7   :  { %p566_p2 = pnand %p564_p1, %p561_p0 }
   0x9   :  { %569 = shalt.err (!%p566_p2)
}
   0xa   :  { %s570_s23 = scalar_lea.vmem %s29_s13, 2048  ;;  %p575_p4 = scmp.lt.s32.totalorder %s29_s13, %s29_s13 }
   0xb   :  { %p571_p3 = scmp.ne.s32.totalorder %s29_s13, %s570_s23  ;;  %p576_p5 = scmp.lt.s32.totalorder %s570_s23, %s570_s23 }
   0xd   :  { %p577_p6 = por %p576_p5, %p575_p4 }
   0xf   :  { %p578_p7 = pnand %p577_p6, %p571_p3 }
  0x11   :  { %581 = shalt.err (!%p578_p7)
}
  0x12   :  { %s656_s24 = smov 128   ;;  %s657_s25 = smov 8  }
  0x13   :  { %34 = dma.hbm_to_vmem [thread:$0]  %s748_s1, 2048, %s29_s13, [#allocation7], %s656_s24, %s656_s24, %s657_s25  }
  0x14   :  { %s582_s30 = scalar_lea.hbm %s747_s0, 2048 }
  0x15   :  { %p583_p8 = scmp.ne.s32.totalorder %s747_s0, %s582_s30  ;;  %p586_p9 = scmp.lt.u32.totalorder %s582_s30, %s747_s0 }
  0x17   :  { %p588_p10 = pnand %p586_p9, %p583_p8 }
  0x19   :  { %591 = shalt.err (!%p588_p10)
}
  0x1a   :  { %s592_s8 = scalar_lea.vmem %s680_s15, 2048  ;;  %p597_p12 = scmp.lt.s32.totalorder %s680_s15, %s680_s15 }
  0x1b   :  { %p593_p11 = scmp.ne.s32.totalorder %s680_s15, %s592_s8  ;;  %p598_p13 = scmp.lt.s32.totalorder %s592_s8, %s592_s8 }
  0x1d   :  { %p599_p0 = por %p598_p13, %p597_p12 }
  0x1f   :  { %p600_p1 = pnand %p599_p0, %p593_p11 }
  0x21   :  { %603 = shalt.err (!%p600_p1)
}
  0x22   :  { %22 = dma.hbm_to_vmem [thread:$0]  %s747_s0, 2048, %s680_s15, [#allocation4], %s656_s24, %s656_s24, %s657_s25  }
  0x23   :  { %s658_s10 = smov [#allocation8]   ;;  %s604_s14 = scalar_lea.hbm %s749_s2, 2048 }
  0x24   :  { %s40_s11 = sshll.u32 %s658_s10, 4  ;;  %p605_p2 = scmp.ne.s32.totalorder %s749_s2, %s604_s14  ;;  %s41_s11 = int_to_ptr.vmem [resolvable:$true] %s40_s11 }
  0x25   :  { %p608_p3 = scmp.lt.u32.totalorder %s604_s14, %s749_s2 }
  0x27   :  { %p610_p4 = pnand %p608_p3, %p605_p2 }
  0x29   :  { %613 = shalt.err (!%p610_p4)
}
  0x2a   :  { %s614_s20 = scalar_lea.vmem %s41_s11, 2048  ;;  %p619_p6 = scmp.lt.s32.totalorder %s41_s11, %s41_s11 }
  0x2b   :  { %p615_p5 = scmp.ne.s32.totalorder %s41_s11, %s614_s20  ;;  %p620_p7 = scmp.lt.s32.totalorder %s614_s20, %s614_s20 }
  0x2d   :  { %p621_p8 = por %p620_p7, %p619_p6 }
  0x2f   :  { %p622_p9 = pnand %p621_p8, %p615_p5 }
  0x31   :  { %625 = shalt.err (!%p622_p9)
}
  0x32   :  { %46 = dma.hbm_to_vmem [thread:$0]  %s749_s2, 2048, %s41_s11, [#allocation7], %s656_s24, %s656_s24, %s657_s25  }
  0x33   :  { %648 = dma.done.wait [#allocation4], 2048  }
  0x34   :  { %649 = vsyncadd [#allocation4], 4294965248 }
  0x35   :  { %650 = dma.done.wait [#allocation7], 4096  }
  0x36   :  { %651 = vsyncadd [#allocation7], 4294963200  ;;  %v108_v0 = vld [vmem:[#allocation6] sm:$0xff]  ;;  %v109_v1 = vld [vmem:[#allocation6 + $0x8] sm:$0xff]  ;;  %s659_s2 = smov [#allocation9]  }
  0x37   :  { %v110_v2 = vld [vmem:[#allocation6 + $0x10] sm:$0xff]  ;;  %v506_v3 = vpack.c.bf16 %v109_v1, %v108_v0  ;;  %v111_v4 = vld [vmem:[#allocation6 + $0x18] sm:$0xff]  ;;  %v112_v6 = vld [vmem:[#allocation6 + $0x20] sm:$0xff]  ;;  %s405_s21 = sshll.u32 %s659_s2, 4  ;;  %s406_s21 = int_to_ptr.vmem [resolvable:$true] %s405_s21 }
  0x38   :  { %v510_v5 = vpack.c.bf16 %v111_v4, %v110_v2  ;;  %v113_v7 = vld [vmem:[#allocation6 + $0x28] sm:$0xff]  ;;  %v92_v9 = vld [vmem:[#allocation3] sm:$0xff]  ;;  %v114_v11 = vld [vmem:[#allocation6 + $0x30] sm:$0xff]  ;;  %s626_s22 = scalar_lea.vmem %s406_s21, 2048  ;;  %p631_p11 = scmp.lt.s32.totalorder %s406_s21, %s406_s21 }
  0x39   :  { %507 = vmatprep.subr.bf16.mxu0 %v506_v3  ;;  %538 = vmatprep.subr.bf16.mxu1 %v506_v3  ;;  %v514_v8 = vpack.c.bf16 %v113_v7, %v112_v6  ;;  %v100_v10 = vld [vmem:[#allocation3 + $0x40] sm:$0xff]  ;;  %v115_v12 = vld [vmem:[#allocation6 + $0x38] sm:$0xff]  ;;  %v117_v15 = vld [vmem:[#allocation6 + $0x48] sm:$0xff]  ;;  %p627_p10 = scmp.ne.s32.totalorder %s406_s21, %s626_s22  ;;  %p632_p12 = scmp.lt.s32.totalorder %s626_s22, %s626_s22 }
  0x3a   :  { %509 = vmatpush3.bf16.msra.mxu0 %v506_v3  ;;  %546 = vmatpush3.bf16.msra.mxu1 %v506_v3  ;;  %v518_v13 = vpack.c.bf16 %v115_v12, %v114_v11  ;;  %v116_v14 = vld [vmem:[#allocation6 + $0x40] sm:$0xff]  ;;  %v118_v17 = vld [vmem:[#allocation6 + $0x50] sm:$0xff]  ;;  %v119_v18 = vld [vmem:[#allocation6 + $0x58] sm:$0xff] }
  0x3b   :  { %511 = vmatprep.subr.bf16.mxu0 %v510_v5  ;;  %539 = vmatprep.subr.bf16.mxu1 %v510_v5  ;;  %v522_v16 = vpack.c.bf16 %v117_v15, %v116_v14  ;;  %v526_v19 = vpack.c.bf16 %v119_v18, %v118_v17  ;;  %v120_v20 = vld [vmem:[#allocation6 + $0x60] sm:$0xff]  ;;  %v121_v21 = vld [vmem:[#allocation6 + $0x68] sm:$0xff]  ;;  %v122_v23 = vld [vmem:[#allocation6 + $0x70] sm:$0xff]  ;;  %p633_p13 = por %p632_p12, %p631_p11 }
  0x3c   :  { %482 = vmatprep.mubr.f32.mxu0 %v92_v9  ;;  %494 = vmatprep.mubr.f32.mxu1 %v100_v10  ;;  %v530_v22 = vpack.c.bf16 %v121_v21, %v120_v20  ;;  %v123_v24 = vld [vmem:[#allocation6 + $0x78] sm:$0xff]  ;;  %v93_v26 = vld [vmem:[#allocation3 + $0x8] sm:$0xff]  ;;  %v94_v28 = vld [vmem:[#allocation3 + $0x10] sm:$0xff] }
  0x3d   :  { %v534_v25 = vpack.c.bf16 %v123_v24, %v122_v23  ;;  %v101_v27 = vld [vmem:[#allocation3 + $0x48] sm:$0xff]  ;;  %v102_v29 = vld [vmem:[#allocation3 + $0x50] sm:$0xff]  ;;  %v95_v30 = vld [vmem:[#allocation3 + $0x18] sm:$0xff]  ;;  %p634_p0 = pnand %p633_p13, %p627_p10 }
  0x3e   :  { %513 = vmatpush3.bf16.msra.mxu0 %v510_v5  ;;  %547 = vmatpush3.bf16.msra.mxu1 %v510_v5  ;;  %v103_v31 = vld [vmem:[#allocation3 + $0x58] sm:$0xff]  ;;  %v96_v32 = vld [vmem:[#allocation3 + $0x20] sm:$0xff]  ;;  %v97_v34 = vld [vmem:[#allocation3 + $0x28] sm:$0xff] }
  0x3f   :  { %515 = vmatprep.subr.bf16.mxu0 %v514_v8  ;;  %540 = vmatprep.subr.bf16.mxu1 %v514_v8  ;;  %v104_v33 = vld [vmem:[#allocation3 + $0x60] sm:$0xff]  ;;  %v105_v35 = vld [vmem:[#allocation3 + $0x68] sm:$0xff]  ;;  %v98_v36 = vld [vmem:[#allocation3 + $0x30] sm:$0xff] }
  0x40   :  { %v106_v37 = vld [vmem:[#allocation3 + $0x70] sm:$0xff]  ;;  %v99_v38 = vld [vmem:[#allocation3 + $0x38] sm:$0xff]  ;;  %v305_v41 = vld [vmem:[#allocation8 + $0x8] sm:$0xff] }
  0x41   :  { %v107_v39 = vld [vmem:[#allocation3 + $0x78] sm:$0xff]  ;;  %v313_v43 = vld [vmem:[#allocation8 + $0x48] sm:$0xff]  ;;  %v304_v47 = vld [vmem:[#allocation8] sm:$0xff] }
  0x42   :  { %517 = vmatpush3.bf16.msra.mxu0 %v514_v8  ;;  %548 = vmatpush3.bf16.msra.mxu1 %v514_v8  ;;  %v312_v49 = vld [vmem:[#allocation8 + $0x40] sm:$0xff]  ;;  %v307_v54 = vld [vmem:[#allocation8 + $0x18] sm:$0xff]  ;;  %v306_v60 = vld [vmem:[#allocation8 + $0x10] sm:$0xff] }
  0x43   :  { %519 = vmatprep.subr.bf16.mxu0 %v518_v13  ;;  %541 = vmatprep.subr.bf16.mxu1 %v518_v13  ;;  %v315_v59 = vld [vmem:[#allocation8 + $0x58] sm:$0xff]  ;;  %v314_v61 = vld [vmem:[#allocation8 + $0x50] sm:$0xff]  ;;  %v309_v10 = vld [vmem:[#allocation8 + $0x28] sm:$0xff] }
  0x44   :  { %v317_v15 = vld [vmem:[#allocation8 + $0x68] sm:$0xff]  ;;  %v316_v17 = vld [vmem:[#allocation8 + $0x60] sm:$0xff] }
  0x46   :  { %521 = vmatpush3.bf16.msra.mxu0 %v518_v13  ;;  %549 = vmatpush3.bf16.msra.mxu1 %v518_v13 }
  0x47   :  { %523 = vmatprep.subr.bf16.mxu0 %v522_v16  ;;  %542 = vmatprep.subr.bf16.mxu1 %v522_v16 }
  0x4a   :  { %525 = vmatpush3.bf16.msra.mxu0 %v522_v16  ;;  %550 = vmatpush3.bf16.msra.mxu1 %v522_v16  ;;  %v308_v16 = vld [vmem:[#allocation8 + $0x20] sm:$0xff] }
  0x4b   :  { %527 = vmatprep.subr.bf16.mxu0 %v526_v19  ;;  %543 = vmatprep.subr.bf16.mxu1 %v526_v19 }
  0x4e   :  { %529 = vmatpush3.bf16.msra.mxu0 %v526_v19  ;;  %551 = vmatpush3.bf16.msra.mxu1 %v526_v19 }
  0x4f   :  { %531 = vmatprep.subr.bf16.mxu0 %v530_v22  ;;  %544 = vmatprep.subr.bf16.mxu1 %v530_v22 }
  0x52   :  { %533 = vmatpush3.bf16.msra.mxu0 %v530_v22  ;;  %552 = vmatpush3.bf16.msra.mxu1 %v530_v22 }
  0x53   :  { %535 = vmatprep.subr.bf16.mxu0 %v534_v25  ;;  %545 = vmatprep.subr.bf16.mxu1 %v534_v25 }
  0x56   :  { %537 = vmatpush3.bf16.msra.mxu0 %v534_v25  ;;  %553 = vmatpush3.bf16.msra.mxu1 %v534_v25 }
  0x59   :  { %483 = vmatmul.mubr.f32.vlgmr.msra.gmra.mrb[0].mxu0 %v93_v26  ;;  %495 = vmatmul.mubr.f32.vlgmr.msra.gmra.mrb[0].mxu1 %v101_v27 }
  0x5a   :  { %485 = vmatprep.mubr.f32.mxu0 %v94_v28  ;;  %497 = vmatprep.mubr.f32.mxu1 %v102_v29 }
  0x5d   :  { %486 = vmatmul.mubr.f32.gmra.mrb[2].mxu0 %v95_v30  ;;  %498 = vmatmul.mubr.f32.gmra.mrb[2].mxu1 %v103_v31  ;;  %v311_v30 = vld [vmem:[#allocation8 + $0x38] sm:$0xff] }
  0x5e   :  { %488 = vmatprep.mubr.f32.mxu0 %v96_v32  ;;  %500 = vmatprep.mubr.f32.mxu1 %v104_v33 }
  0x61   :  { %489 = vmatmul.mubr.f32.gmra.mrb[4].mxu0 %v97_v34  ;;  %501 = vmatmul.mubr.f32.gmra.mrb[4].mxu1 %v105_v35  ;;  %v319_v35 = vld [vmem:[#allocation8 + $0x78] sm:$0xff] }
  0x62   :  { %491 = vmatprep.mubr.f32.mxu0 %v98_v36  ;;  %503 = vmatprep.mubr.f32.mxu1 %v106_v37  ;;  %v310_v36 = vld [vmem:[#allocation8 + $0x30] sm:$0xff] }
  0x63   :  { %v318_v37 = vld [vmem:[#allocation8 + $0x70] sm:$0xff] }
  0x65   :  { %492 = vmatmul.mubr.f32.gmra.mrb[6].mxu0 %v99_v38  ;;  %504 = vmatmul.mubr.f32.gmra.mrb[6].mxu1 %v107_v39 }
 0x12c   :  { %v484_v40 = vpop.f32.mrb[0].mxu0  ;;  %v496_v42 = vpop.f32.mrb[0].mxu1 }
 0x12d   :  { %v337_v44 = vmul.f32 3.0, %v484_v40  ;;  %v345_v45 = vmul.f32 3.0, %v496_v42  ;;  %v190_v46 = vpop.f32.mrb[1].mxu0  ;;  %v230_v48 = vpop.f32.mrb[1].mxu1 }
 0x12e   :  { %v336_v50 = vmul.f32 3.0, %v190_v46  ;;  %v344_v51 = vmul.f32 3.0, %v230_v48 }
 0x12f   :  { %v353_v52 = vadd.f32 %v337_v44, %v305_v41  ;;  %v361_v53 = vadd.f32 %v345_v45, %v313_v43 }
 0x130   :  { %v352_v55 = vadd.f32 %v336_v50, %v304_v47  ;;  %v360_v56 = vadd.f32 %v344_v51, %v312_v49  ;;  %v487_v57 = vpop.f32.mrb[2].mxu0  ;;  %v499_v58 = vpop.f32.mrb[2].mxu1 }
 0x131   :  { %v369_v62 = vmul.f32 0.25, %v353_v52  ;;  %v377_v63 = vmul.f32 0.25, %v361_v53  ;;  %v339_v0 = vmul.f32 3.0, %v487_v57  ;;  %v347_v1 = vmul.f32 3.0, %v499_v58  ;;  %v200_v2 = vpop.f32.mrb[3].mxu0  ;;  %v240_v3 = vpop.f32.mrb[3].mxu1 }
 0x132   :  { %v368_v4 = vmul.f32 0.25, %v352_v55  ;;  %v376_v5 = vmul.f32 0.25, %v360_v56  ;;  %v338_v6 = vmul.f32 3.0, %v200_v2  ;;  %v346_v7 = vmul.f32 3.0, %v240_v3 }
 0x133   :  { %385 = vst [vmem:[#allocation9 + $0x8] sm:$0xff] %v369_v62  ;;  %393 = vst [vmem:[#allocation9 + $0x48] sm:$0xff] %v377_v63  ;;  %v355_v8 = vadd.f32 %v339_v0, %v307_v54  ;;  %v363_v9 = vadd.f32 %v347_v1, %v315_v59 }
 0x134   :  { %384 = vst [vmem:[#allocation9] sm:$0xff] %v368_v4  ;;  %392 = vst [vmem:[#allocation9 + $0x40] sm:$0xff] %v376_v5  ;;  %v354_v11 = vadd.f32 %v338_v6, %v306_v60  ;;  %v362_v12 = vadd.f32 %v346_v7, %v314_v61  ;;  %v490_v13 = vpop.f32.mrb[4].mxu0  ;;  %v502_v14 = vpop.f32.mrb[4].mxu1 }
 0x135   :  { %v371_v18 = vmul.f32 0.25, %v355_v8  ;;  %v379_v19 = vmul.f32 0.25, %v363_v9  ;;  %v341_v20 = vmul.f32 3.0, %v490_v13  ;;  %v349_v21 = vmul.f32 3.0, %v502_v14  ;;  %v210_v22 = vpop.f32.mrb[5].mxu0  ;;  %v250_v23 = vpop.f32.mrb[5].mxu1 }
 0x136   :  { %v370_v24 = vmul.f32 0.25, %v354_v11  ;;  %v378_v25 = vmul.f32 0.25, %v362_v12  ;;  %v340_v26 = vmul.f32 3.0, %v210_v22  ;;  %v348_v27 = vmul.f32 3.0, %v250_v23 }
 0x137   :  { %387 = vst [vmem:[#allocation9 + $0x18] sm:$0xff] %v371_v18  ;;  %395 = vst [vmem:[#allocation9 + $0x58] sm:$0xff] %v379_v19  ;;  %v357_v28 = vadd.f32 %v341_v20, %v309_v10  ;;  %v365_v29 = vadd.f32 %v349_v21, %v317_v15 }
 0x138   :  { %386 = vst [vmem:[#allocation9 + $0x10] sm:$0xff] %v370_v24  ;;  %394 = vst [vmem:[#allocation9 + $0x50] sm:$0xff] %v378_v25  ;;  %v356_v31 = vadd.f32 %v340_v26, %v308_v16  ;;  %v364_v32 = vadd.f32 %v348_v27, %v316_v17  ;;  %v493_v33 = vpop.f32.mrb[6].mxu0  ;;  %v505_v34 = vpop.f32.mrb[6].mxu1 }
 0x139   :  { %v373_v38 = vmul.f32 0.25, %v357_v28  ;;  %v381_v39 = vmul.f32 0.25, %v365_v29  ;;  %v343_v40 = vmul.f32 3.0, %v493_v33  ;;  %v351_v41 = vmul.f32 3.0, %v505_v34  ;;  %v220_v42 = vpop.f32.mrb[7].mxu0  ;;  %v260_v43 = vpop.f32.mrb[7].mxu1 }
 0x13a   :  { %v372_v44 = vmul.f32 0.25, %v356_v31  ;;  %v380_v45 = vmul.f32 0.25, %v364_v32  ;;  %v342_v46 = vmul.f32 3.0, %v220_v42  ;;  %v350_v47 = vmul.f32 3.0, %v260_v43 }
 0x13b   :  { %389 = vst [vmem:[#allocation9 + $0x28] sm:$0xff] %v373_v38  ;;  %397 = vst [vmem:[#allocation9 + $0x68] sm:$0xff] %v381_v39  ;;  %v359_v48 = vadd.f32 %v343_v40, %v311_v30  ;;  %v367_v49 = vadd.f32 %v351_v41, %v319_v35 }
 0x13c   :  { %388 = vst [vmem:[#allocation9 + $0x20] sm:$0xff] %v372_v44  ;;  %396 = vst [vmem:[#allocation9 + $0x60] sm:$0xff] %v380_v45  ;;  %v358_v50 = vadd.f32 %v342_v46, %v310_v36  ;;  %v366_v51 = vadd.f32 %v350_v47, %v318_v37 }
 0x13d   :  { %v375_v52 = vmul.f32 0.25, %v359_v48  ;;  %v383_v53 = vmul.f32 0.25, %v367_v49 }
 0x13e   :  { %v374_v54 = vmul.f32 0.25, %v358_v50  ;;  %v382_v55 = vmul.f32 0.25, %v366_v51 }
 0x13f   :  { %391 = vst [vmem:[#allocation9 + $0x38] sm:$0xff] %v375_v52  ;;  %399 = vst [vmem:[#allocation9 + $0x78] sm:$0xff] %v383_v53 }
 0x140   :  { %390 = vst [vmem:[#allocation9 + $0x30] sm:$0xff] %v374_v54  ;;  %398 = vst [vmem:[#allocation9 + $0x70] sm:$0xff] %v382_v55 }
 0x141   :  { %637 = shalt.err (!%p634_p0)
}
 0x142   :  { %s638_s27 = scalar_lea.hbm %s750_s3, 2048 }
 0x143   :  { %p639_p1 = scmp.ne.s32.totalorder %s750_s3, %s638_s27  ;;  %p642_p2 = scmp.lt.u32.totalorder %s638_s27, %s750_s3 }
 0x145   :  { %p644_p3 = pnand %p642_p2, %p639_p1 }
 0x147   :  { %647 = shalt.err (!%p644_p3)
}
 0x148   :  { %411 = dma.vmem_to_hbm [thread:$0]  %s406_s21, 2048, %s750_s3, [#allocation5], %s656_s24, %s656_s24, %s657_s25  }
 0x149   :  { %652 = dma.done.wait [#allocation5], 2048  }
 0x14a   :  { %653 = vsyncadd [#allocation5], 4294965248 }
 0x14b   :  { %415 = vsyncpa [#allocation4], 1 }
 0x14c   :  { %416 = vsyncpa [#allocation7], 1 }
 0x14d   :  { %417 = vsyncpa [#allocation5], 1 }

</bundles_post_ra>
